<compile_context>
chip_gen: v5e
topology: v5e:2x2
jax: 0.10.0
libtpu: 0.0.40
codegen_flags: <defaults>
</compile_context>

<pallas_src>
import functools

import jax
import jax.numpy as jnp
import numpy as np
from jax import lax
from jax.experimental import pallas as pl
from jax.experimental.pallas import tpu as pltpu


# ----------------------------------------------------------------------------
# Fused Pallas kernel: all layers, all heads, one grid step.
# ----------------------------------------------------------------------------
def _gat_fused_kernel(*refs, num_layers, num_heads, num_nodes):
    """refs = (x, adj, w_stack[0], ..., w_stack[L-1], out)."""
    x_ref, adj_ref = refs[0], refs[1]
    w_refs = refs[2:2 + num_layers]
    out_ref = refs[2 + num_layers]

    # Attention matrix, shared by every head and every layer.
    # The pre-mask logit is a single scalar per head, so the row-wise
    # softmax(masked_fill(adj == 0, -1e9)) is exactly:
    #   deg(i) > 0 : 1/deg(i) on neighbours, 0 elsewhere (masked exp underflows)
    #   deg(i) == 0: uniform 1/N (every logit in the row equals -1e9)
    # independent of that scalar -- identical to the reference softmax.
    adj = adj_ref[...]
    mask = (adj != 0.0).astype(jnp.float32)             # (N, N)
    deg = jnp.sum(mask, axis=-1, keepdims=True)         # (N, 1) XLU reduce
    safe_deg = jnp.maximum(deg, 1.0)
    attn = jnp.where(deg > 0.0, mask / safe_deg,
                     jnp.float32(1.0 / num_nodes))      # (N, N)

    h = x_ref[...]                                      # (N, C0) f32
    for li in range(num_layers):                        # unrolled at trace time
        w = w_refs[li][...]                             # (H*C, C)
        # Head-concatenated value slab:
        #   value[n, hh*C + c] = sum_k w[hh*C + c, k] * h[n, k]
        value = lax.dot_general(h, w, (((1,), (1,)), ((), ())),
                                preferred_element_type=jnp.float32)  # (N, H*C)
        if li != num_layers - 1:
            z = jnp.dot(attn, value, preferred_element_type=jnp.float32)
            h = jnp.where(z > 0.0, z, jnp.exp(z) - 1.0)               # ELU(1.0)
        else:
            # mean over heads commutes with the (linear) attention matmul.
            cout = value.shape[1] // num_heads
            v_sum = value[:, 0:cout]
            for hh in range(1, num_heads):
                v_sum = v_sum + value[:, hh * cout:(hh + 1) * cout]
            v_mean = v_sum * jnp.float32(1.0 / num_heads)
            z = jnp.dot(attn, v_mean, preferred_element_type=jnp.float32)
            out_ref[...] = 1.0 / (1.0 + jnp.exp(-z))                  # Sigmoid


# ----------------------------------------------------------------------------
# Wrappers
# ----------------------------------------------------------------------------
def to_dense_adj(edge_index, num_nodes):
    # TODO(synk): scatter-based to_dense_adj stays in plain JAX (index glue).
    adj = jnp.zeros((num_nodes, num_nodes), jnp.float32)
    return adj.at[edge_index[0], edge_index[1]].add(1.0)


@functools.partial(jax.jit, static_argnames=("num_nodes",))
def gat_model_forward(x, edge_index, params, *, num_nodes, slope=0.2):
    # The LeakyReLU only acts on a per-head scalar that cancels inside the
    # softmax, so `slope` (and query/key weights) cannot affect the output.
    del slope
    adj = to_dense_adj(edge_index, num_nodes)
    x = x.astype(jnp.float32)
    num_layers = len(params)
    num_heads = params[0]["linear_weight"].shape[0]
    out_channels = params[-1]["linear_weight"].shape[2]

    # Stack per-head linear weights lane-wise: (H, Cin, Cout) -> (H*Cin, Cout)
    # so each layer's per-head values are one MXU matmul writing the
    # head-concatenated (N, H*Cout) slab (literal math requires Cin == Cout).
    w_stacks = []
    for p in params:
        w = p["linear_weight"].astype(jnp.float32)
        H, cin, cout = w.shape
        assert cin == cout, "literal PyTorch GATLayer matmul requires Cin == Cout"
        w_stacks.append(w.reshape(H * cin, cout))

    kernel = functools.partial(
        _gat_fused_kernel,
        num_layers=num_layers, num_heads=num_heads, num_nodes=num_nodes)

    # TODO(synk): for real TU-dataset training, batch graphs along the node
    # axis (>=128 rows) and tile the adjacency (v7x VMEM = 64 MiB); at this toy
    # size a single whole-array VMEM block per operand is optimal.
    return pl.pallas_call(
        kernel,
        out_shape=jax.ShapeDtypeStruct((num_nodes, out_channels), jnp.float32),
        in_specs=[pl.BlockSpec(memory_space=pltpu.MemorySpace.VMEM)]
                 * (2 + num_layers),
        out_specs=pl.BlockSpec(memory_space=pltpu.MemorySpace.VMEM),
    )(x, adj, *w_stacks)


def init_gat_params(key, *, num_layers, num_heads, in_channels, hidden_channels,
                    out_channels):
    params = []
    for i in range(num_layers):
        cin = in_channels if i == 0 else hidden_channels * num_heads
        cout = out_channels if i == num_layers - 1 else hidden_channels
        key, k1, k2, k3 = jax.random.split(key, 4)
        params.append(
            dict(
                linear_weight=jax.random.normal(k1, (num_heads, cin, cout),
                                                jnp.float32),
                query_weight=jax.random.normal(k2, (num_heads, 1, cout),
                                               jnp.float32),
                key_weight=jax.random.normal(k3, (num_heads, 1, cout),
                                             jnp.float32),
            )
        )
    return params


# ----------------------------------------------------------------------------
# Pure-numpy reference (literal PyTorch semantics, q/k/softmax included)
# ----------------------------------------------------------------------------
def gat_model_reference(x, edge_index, params, *, num_nodes, slope=0.2):
    x = np.asarray(x, np.float32)
    ei = np.asarray(edge_index)
    adj = np.zeros((num_nodes, num_nodes), np.float32)
    np.add.at(adj, (ei[0], ei[1]), 1.0)
    n_layers = len(params)
    for i, p in enumerate(params):
        W = np.asarray(p["linear_weight"], np.float32)
        qw = np.asarray(p["query_weight"], np.float32)
        kw = np.asarray(p["key_weight"], np.float32)
        lti = np.einsum("hik,nk->hin", W, x)            # matmul(W, x^T)
        q = np.einsum("hoc,hcn->hon", qw, lti)          # (H,1,N)
        k = np.einsum("hoc,hcn->hon", kw, lti)          # (H,1,N)
        value = np.transpose(lti, (0, 2, 1))            # (H,N,C)
        s = np.einsum("hon,hpn->hop", q, k)             # (H,1,1)
        s = np.where(s >= 0, s, slope * s)              # LeakyReLU
        logits = np.where(adj[None] == 0.0, np.float32(-1e9), s).astype(np.float32)
        m = logits.max(-1, keepdims=True)
        e = np.exp(logits - m)
        attn = e / e.sum(-1, keepdims=True)
        out = np.einsum("hij,hjc->hic", attn, value)    # (H,N,C)
        if i != n_layers - 1:
            x = np.transpose(out, (1, 0, 2)).reshape(num_nodes, -1)
            x = np.where(x > 0, x, np.exp(x) - 1.0)     # ELU
        else:
            x = out.mean(0)
            x = 1.0 / (1.0 + np.exp(-x))                # Sigmoid
    return x


# ----------------------------------------------------------------------------
if __name__ == "__main__":
    # Config chosen so the literal PyTorch forward is shape-valid:
    #   layer0: Cin = in_channels = 8 == hidden_channels = Cout
    #   layer1: Cin = hidden*heads = 16 == out_channels = Cout
    num_layers = 2
    num_nodes = 16
    num_heads = 2
    in_channels = 8
    hidden_channels = 8
    out_channels = hidden_channels * num_heads  # 16

    key = jax.random.PRNGKey(0)
    key, kx = jax.random.split(key)
    x = jax.random.normal(kx, (num_nodes, in_channels), jnp.float32)

    # deterministic bidirectional ring over the first 14 nodes;
    # nodes 14 and 15 are isolated (exercises the deg==0 / uniform-1/N path).
    ring = num_nodes - 2
    src = jnp.arange(ring, dtype=jnp.int32)
    dst = (src + 1) % ring
    edge_index = jnp.stack(
        [jnp.concatenate([src, dst]), jnp.concatenate([dst, src])], axis=0
    )

    params = init_gat_params(
        key,
        num_layers=num_layers,
        num_heads=num_heads,
        in_channels=in_channels,
        hidden_channels=hidden_channels,
        out_channels=out_channels,
    )

    out = gat_model_forward(x, edge_index, params, num_nodes=num_nodes)
    out = jax.block_until_ready(out)

    ref = gat_model_reference(x, edge_index, params, num_nodes=num_nodes)
    np.testing.assert_allclose(np.asarray(out), ref, rtol=5e-3, atol=5e-3)

    print("KERNEL_OK")
</pallas_src>

<mosaic_0001>
module attributes {stable_mosaic.version = 11 : i64} {
  func.func @_gat_fused_kernel(%arg0: memref<16x8xf32, #tpu.memory_space<vmem>>, %arg1: memref<16x16xf32, #tpu.memory_space<vmem>>, %arg2: memref<16x8xf32, #tpu.memory_space<vmem>>, %arg3: memref<32x16xf32, #tpu.memory_space<vmem>>, %arg4: memref<16x16xf32, #tpu.memory_space<vmem>>) attributes {dimension_semantics = [], scalar_prefetch = 0 : i64, scratch_operands = 0 : i64, tpu.core_type = #tpu.core_type<tc>} {
    %c0 = arith.constant 0 : index
    %c0_0 = arith.constant 0 : index
    %0 = vector.load %arg1[%c0, %c0_0] : memref<16x16xf32, #tpu.memory_space<vmem>>, vector<16x16xf32>
    %cst = arith.constant 0.000000e+00 : f32
    %1 = vector.broadcast %cst : f32 to vector<16x16xf32>
    %2 = arith.cmpf one, %0, %1 : vector<16x16xf32>
    %3 = arith.extui %2 : vector<16x16xi1> to vector<16x16xi32>
    %4 = arith.sitofp %3 : vector<16x16xi32> to vector<16x16xf32>
    %cst_1 = arith.constant dense<0.000000e+00> : vector<16xf32>
    %5 = vector.multi_reduction <add>, %4, %cst_1 [1] : vector<16x16xf32> to vector<16xf32>
    %6 = vector.shape_cast %5 : vector<16xf32> to vector<16x1xf32>
    %cst_2 = arith.constant 1.000000e+00 : f32
    %7 = vector.broadcast %cst_2 : f32 to vector<16x1xf32>
    %8 = arith.maximumf %6, %7 : vector<16x1xf32>
    %cst_3 = arith.constant 0.000000e+00 : f32
    %9 = vector.broadcast %cst_3 : f32 to vector<16x1xf32>
    %10 = arith.cmpf ogt, %6, %9 : vector<16x1xf32>
    %11 = vector.broadcast %8 : vector<16x1xf32> to vector<16x16xf32>
    %12 = arith.divf %4, %11 : vector<16x16xf32>
    %cst_4 = arith.constant 6.250000e-02 : f32
    %13 = vector.shape_cast %10 : vector<16x1xi1> to vector<16x1xi1>
    %14 = vector.broadcast %13 : vector<16x1xi1> to vector<16x16xi1>
    %15 = vector.broadcast %cst_4 : f32 to vector<16x16xf32>
    %16 = arith.select %14, %12, %15 : vector<16x16xi1>, vector<16x16xf32>
    %c0_5 = arith.constant 0 : index
    %c0_6 = arith.constant 0 : index
    %17 = vector.load %arg0[%c0_5, %c0_6] : memref<16x8xf32, #tpu.memory_space<vmem>>, vector<16x8xf32>
    %c0_7 = arith.constant 0 : index
    %c0_8 = arith.constant 0 : index
    %18 = vector.load %arg2[%c0_7, %c0_8] : memref<16x8xf32, #tpu.memory_space<vmem>>, vector<16x8xf32>
    %cst_9 = arith.constant dense<0.000000e+00> : vector<16x16xf32>
    %19 = tpu.matmul %17, %18, %cst_9 {dimension_numbers = #tpu.dot_dimension_numbers<[1], [1], [0], [0], [0, 0, 1, 0], [], []>} : vector<16x8xf32>, vector<16x8xf32>, vector<16x16xf32> -> vector<16x16xf32>
    %cst_10 = arith.constant dense<0.000000e+00> : vector<16x16xf32>
    %20 = tpu.matmul %16, %19, %cst_10 {dimension_numbers = #tpu.dot_dimension_numbers<[1], [0], [0], [1], [0, 0, 1, 1], [], []>} : vector<16x16xf32>, vector<16x16xf32>, vector<16x16xf32> -> vector<16x16xf32>
    %cst_11 = arith.constant 0.000000e+00 : f32
    %21 = vector.broadcast %cst_11 : f32 to vector<16x16xf32>
    %22 = arith.cmpf ogt, %20, %21 : vector<16x16xf32>
    %23 = math.exp %20 : vector<16x16xf32>
    %cst_12 = arith.constant 1.000000e+00 : f32
    %24 = vector.broadcast %cst_12 : f32 to vector<16x16xf32>
    %25 = arith.subf %23, %24 : vector<16x16xf32>
    %26 = arith.select %22, %20, %25 : vector<16x16xi1>, vector<16x16xf32>
    %c0_13 = arith.constant 0 : index
    %c0_14 = arith.constant 0 : index
    %27 = vector.load %arg3[%c0_13, %c0_14] : memref<32x16xf32, #tpu.memory_space<vmem>>, vector<32x16xf32>
    %cst_15 = arith.constant dense<0.000000e+00> : vector<16x32xf32>
    %28 = tpu.matmul %26, %27, %cst_15 {dimension_numbers = #tpu.dot_dimension_numbers<[1], [1], [0], [0], [0, 0, 1, 0], [], []>} : vector<16x16xf32>, vector<32x16xf32>, vector<16x32xf32> -> vector<16x32xf32>
    %29 = vector.extract_strided_slice %28 {offsets = [0, 0], sizes = [16, 16], strides = [1, 1]} : vector<16x32xf32> to vector<16x16xf32>
    %30 = vector.extract_strided_slice %28 {offsets = [0, 16], sizes = [16, 16], strides = [1, 1]} : vector<16x32xf32> to vector<16x16xf32>
    %31 = arith.addf %29, %30 : vector<16x16xf32>
    %cst_16 = arith.constant 5.000000e-01 : f32
    %32 = vector.broadcast %cst_16 : f32 to vector<16x16xf32>
    %33 = arith.mulf %31, %32 : vector<16x16xf32>
    %cst_17 = arith.constant dense<0.000000e+00> : vector<16x16xf32>
    %34 = tpu.matmul %16, %33, %cst_17 {dimension_numbers = #tpu.dot_dimension_numbers<[1], [0], [0], [1], [0, 0, 1, 1], [], []>} : vector<16x16xf32>, vector<16x16xf32>, vector<16x16xf32> -> vector<16x16xf32>
    %cst_18 = arith.constant 0.000000e+00 : f32
    %35 = vector.broadcast %cst_18 : f32 to vector<16x16xf32>
    %36 = arith.subf %35, %34 : vector<16x16xf32>
    %37 = math.exp %36 : vector<16x16xf32>
    %cst_19 = arith.constant 1.000000e+00 : f32
    %38 = vector.broadcast %cst_19 : f32 to vector<16x16xf32>
    %39 = arith.addf %38, %37 : vector<16x16xf32>
    %cst_20 = arith.constant 1.000000e+00 : f32
    %40 = vector.broadcast %cst_20 : f32 to vector<16x16xf32>
    %41 = arith.divf %40, %39 : vector<16x16xf32>
    %c0_21 = arith.constant 0 : index
    %c0_22 = arith.constant 0 : index
    %42 = vector.load %arg4[%c0_21, %c0_22] : memref<16x16xf32, #tpu.memory_space<vmem>>, vector<16x16xf32>
    tpu.vector_store %arg4[%c0_21, %c0_22], %41 {strides = array<i32>} : memref<16x16xf32, #tpu.memory_space<vmem>>, vector<16x16xf32>,
    return
  }
}

</mosaic_0001>

<bundles_post_ra>
// kernel: gat_model_forward.1
= control target key start
LH: loop header
LB: loop body
LE: loop exit
PB: predicated region body
PF: predicated region fallthrough
CT: control target
= control target key end

     0   :  { %vm77_vm0 = vcmask 64512   ;;  %vm26_vm1 = vcmask 130048   ;;  %v359_v3 = vmov 0.0   ;;  %s444_s0 = inlined_call_operand.vmem [shape: f32[16,8], index: 0, kind: input, shape index: {}]   ;;  %s445_s1 = inlined_call_operand.vmem [shape: f32[16,16], index: 1, kind: input, shape index: {}]   ;;  %s446_s2 = inlined_call_operand.vmem [shape: f32[16,8], index: 2, kind: input, shape index: {}]   ;;  %s447_s3 = inlined_call_operand.vmem [shape: f32[32,16], index: 3, kind: input, shape index: {}]   ;;  %s448_s4 = inlined_call_operand.hbm [shape: f32[16,16], index: 4, kind: output, shape index: {}]  }
   0x1   :  { %v76_v0 = vld [vmem:[%s446_s2 + $0x8] sm:$0xff]  ;;  %v18_v1 = vld [vmem:[%s445_s1] sm:$0xff] }
   0x2   :  { %292 = vmatpush.xpose.msk.msra.mxu0 %vm77_vm0, %v76_v0  ;;  %vm20_vm2 = vcmp.ne.f32.partialorder %v18_v1, 0.0  ;;  %v19_v2 = vld [vmem:[%s445_s1 + $0x8] sm:$0xff]  ;;  %v75_v5 = vld [vmem:[%s446_s2] sm:$0xff] }
   0x3   :  { %v290_v4 = vsel %vm20_vm2, 1.0, %v359_v3 }
   0x4   :  { %9 = vsyncpa [#allocation3], 0  ;;  %v27_v6 = vsel %vm26_vm1, %v290_v4, 0.0  ;;  %vm21_vm3 = vcmp.ne.f32.partialorder %v19_v2, 0.0  ;;  %v73_v7 = vld [vmem:[%s444_s0] sm:$0xff]  ;;  %v74_v10 = vld [vmem:[%s444_s0 + $0x8] sm:$0xff] }
   0x5   :  { %28 = vadd.xlane.f32.xlu0 %v27_v6  ;;  %v291_v8 = vsel %vm21_vm3, 1.0, %v359_v3  ;;  %v155_v13 = vld [vmem:[%s447_s3 + $0x18] sm:$0xff]  ;;  %v154_v42 = vld [vmem:[%s447_s3 + $0x10] sm:$0xff]  ;;  %v153_v43 = vld [vmem:[%s447_s3 + $0x8] sm:$0xff]  ;;  %s361_s6 = smov [#allocation2]   ;;  %s278_s10 = sshll.u32 %s448_s4, 4  ;;  %s279_s10 = int_to_ptr.hbm [resolvable:$true] %s278_s10 }
   0x6   :  { %293 = vmatpush.xpose.msk.msra.mxu0 %vm77_vm0, %v75_v5  ;;  %v30_v9 = vsel %vm26_vm1, %v291_v8, 0.0  ;;  %308 = vmatpush.xpose.msk.msra.mxu2 %vm26_vm1, %v155_v13  ;;  %v152_v44 = vld [vmem:[%s447_s3] sm:$0xff]  ;;  %s360_s3 = smov 112   ;;  %s276_s7 = sshll.u32 %s361_s6, 4  ;;  %s277_s7 = int_to_ptr.vmem [resolvable:$true] %s276_s7 }
   0x7   :  { %s362_s11 = smov 128   ;;  %s363_s12 = smov 8  }
   0x9   :  { %294 = vmatmul.msk.f32.vlgmr.msra.gmra.mxu0 %vm77_vm0, %v73_v7 }
   0xa   :  { %309 = vmatpush.xpose.msk.msra.mxu2 %vm26_vm1, %v154_v42 }
   0xd   :  { %31 = vadd.xlane.f32.xlu0 %v30_v9 }
   0xe   :  { %310 = vmatpush.xpose.msk.msra.mxu2 %vm26_vm1, %v153_v43 }
  0x11   :  { %295 = vmatmul.msk.f32.gmra.mxu0 %vm77_vm0, %v74_v10 }
  0x12   :  { %311 = vmatpush.xpose.msk.msra.mxu2 %vm26_vm1, %v152_v44 }
  0x78   :  { %v29_v11 = vpop.xlane.xlu0 %28 }
  0x79   :  { %v33_v12 = vmax.f32 %v29_v11, 1.0  ;;  %vm35_vm9 = vcmp.gt.f32.partialorder %v29_v11, 0.0 }
  0x7b   :  { %317 = vrcp.f32 %v33_v12  ;;  %v48_v19 = vand.u32 2147483648, %v33_v12  ;;  %v46_v22 = vand.u32 2147483647, %v33_v12  ;;  %vm42_vm5 = vweird.f32 %v33_v12 }
  0x7d   :  { %v49_v25 = vor.u32 1.1754944e-38, %v48_v19  ;;  %vm47_vm7 = vcmp.eq.f32.partialorder %v46_v22, 8.507059e+37 }
  0x80   :  { %v32_v14 = vpop.xlane.xlu0 %31 }
  0x81   :  { %v318_v15 = vpop.eup %317  ;;  %v34_v16 = vmax.f32 %v32_v14, 1.0  ;;  %vm36_vm13 = vcmp.gt.f32.partialorder %v32_v14, 0.0 }
  0x82   :  { %v38_v17 = vmul.f32 %v318_v15, %v33_v12  ;;  %vm43_vm4 = vweird.f32 %v318_v15 }
  0x83   :  { %319 = vrcp.f32 %v34_v16  ;;  %vm44_vm6 = vmor %vm42_vm5, %vm43_vm4  ;;  %v63_v30 = vand.u32 2147483648, %v34_v16  ;;  %v61_v33 = vand.u32 2147483647, %v34_v16  ;;  %vm57_vm10 = vweird.f32 %v34_v16 }
  0x84   :  { %v39_v18 = vsub.f32 1.0, %v38_v17 }
  0x85   :  { %v64_v36 = vor.u32 1.1754944e-38, %v63_v30  ;;  %vm62_vm12 = vcmp.eq.f32.partialorder %v61_v33, 8.507059e+37 }
  0x86   :  { %v107_v20 = vpop.f32.mrf.mxu0  ;;  %v40_v21 = vmul.f32 %v318_v15, %v39_v18 }
  0x88   :  { %v41_v23 = vadd.f32 %v318_v15, %v40_v21 }
  0x89   :  { %v320_v24 = vpop.eup %319 }
  0x8a   :  { %v53_v26 = vmul.f32 %v320_v24, %v34_v16  ;;  %v45_v27 = vsel %vm44_vm6, %v318_v15, %v41_v23  ;;  %vm58_vm8 = vweird.f32 %v320_v24 }
  0x8b   :  { %v50_v28 = vsel %vm47_vm7, %v49_v25, %v45_v27  ;;  %vm59_vm11 = vmor %vm57_vm10, %vm58_vm8 }
  0x8c   :  { %v54_v29 = vsub.f32 1.0, %v53_v26  ;;  %v51_v31 = vmul.f32 %v290_v4, %v50_v28 }
  0x8e   :  { %v55_v32 = vmul.f32 %v320_v24, %v54_v29  ;;  %v110_v34 = vpop.f32.mrf.mxu0  ;;  %v71_v37 = vsel %vm35_vm9, %v51_v31, 0.0625 }
  0x8f   :  { %133 = vmatpush.msra.mxu1 %v110_v34 }
  0x90   :  { %v56_v35 = vadd.f32 %v320_v24, %v55_v32 }
  0x91   :  { %134 = vmatpush.msra.mxu1 %v107_v20 }
  0x92   :  { %v60_v38 = vsel %vm59_vm11, %v320_v24, %v56_v35  ;;  %296 = vmatmul.msk.f32.vlgmr.msra.gmra.mxu1 %vm26_vm1, %v71_v37 }
  0x93   :  { %v65_v39 = vsel %vm62_vm12, %v64_v36, %v60_v38  ;;  %300 = vmatpush.xpose.msk.msrb.mxu1 %vm26_vm1, %v155_v13 }
  0x94   :  { %v66_v40 = vmul.f32 %v291_v8, %v65_v39 }
  0x96   :  { %v72_v41 = vsel %vm36_vm13, %v66_v40, 0.0625 }
  0x97   :  { %301 = vmatpush.xpose.msk.msrb.mxu1 %vm26_vm1, %v154_v42 }
  0x9a   :  { %297 = vmatmul.msk.f32.gmra.mxu1 %vm26_vm1, %v72_v41 }
  0x9b   :  { %302 = vmatpush.xpose.msk.msrb.mxu1 %vm26_vm1, %v153_v43 }
  0x9f   :  { %303 = vmatpush.xpose.msk.msrb.mxu1 %vm26_vm1, %v152_v44 }
 0x10f   :  { %v136_v45 = vpop.f32.mrf.mxu1 }
 0x110   :  { %v144_v46 = vmul.f32 1.442695, %v136_v45  ;;  %vm142_vm14 = vcmp.gt.f32.partialorder %v136_v45, 0.0 }
 0x112   :  { %321 = vpow2.f32 %v144_v46 }
 0x117   :  { %v139_v47 = vpop.f32.mrf.mxu1 }
 0x118   :  { %v322_v48 = vpop.eup %321  ;;  %v146_v49 = vmul.f32 1.442695, %v139_v47  ;;  %vm143_vm15 = vcmp.gt.f32.partialorder %v139_v47, 0.0 }
 0x119   :  { %v298_v50 = vadd.f32 -1.0, %v322_v48 }
 0x11a   :  { %323 = vpow2.f32 %v146_v49 }
 0x11b   :  { %v150_v51 = vsel %vm142_vm14, %v136_v45, %v298_v50 }
 0x11c   :  { %304 = vmatmul.msk.f32.vlgmr.msrb.gmra.mxu1 %vm26_vm1, %v150_v51 }
 0x120   :  { %v324_v52 = vpop.eup %323 }
 0x121   :  { %v299_v53 = vadd.f32 -1.0, %v324_v52 }
 0x123   :  { %v151_v54 = vsel %vm143_vm15, %v139_v47, %v299_v53 }
 0x124   :  { %305 = vmatmul.msk.f32.vlgmr.msra.gmra.mxu2 %vm26_vm1, %v151_v54 }
 0x199   :  { %v191_v56 = vpop.f32.mrf.mxu1 }
 0x1a7   :  { %v194_v55 = vpop.f32.mrf.mxu2 }
 0x1a8   :  { %201 = vrot.lane.b32.xlu1 %v194_v55, %s360_s3 }
 0x1b0   :  { %199 = vrot.lane.b32.xlu1 %v191_v56, %s360_s3 }
 0x21a   :  { %v202_v57 = vpop.permute.xlu1 %201 }
 0x21b   :  { %v206_v58 = vadd.f32 %v202_v57, %v194_v55 }
 0x21d   :  { %v208_v59 = vmul.f32 0.5, %v206_v58 }
 0x21f   :  { %223 = vmatpush.msra.mxu3 %v208_v59 }
 0x222   :  { %v200_v60 = vpop.permute.xlu1 %199 }
 0x223   :  { %v205_v61 = vadd.f32 %v200_v60, %v191_v56 }
 0x225   :  { %v207_v62 = vmul.f32 0.5, %v205_v61 }
 0x227   :  { %224 = vmatpush.msra.mxu3 %v207_v62 }
 0x228   :  { %306 = vmatmul.msk.f32.vlgmr.msra.gmra.mxu3 %vm26_vm1, %v71_v37 }
 0x230   :  { %307 = vmatmul.msk.f32.gmra.mxu3 %vm26_vm1, %v72_v41 }
 0x2ab   :  { %v226_v63 = vpop.f32.mrf.mxu3 }
 0x2ac   :  { %v232_v0 = vsub.f32 0.0, %v226_v63 }
 0x2ae   :  { %v234_v1 = vmul.f32 1.442695, %v232_v0 }
 0x2b0   :  { %325 = vpow2.f32 %v234_v1 }
 0x2b3   :  { %v229_v2 = vpop.f32.mrf.mxu3 }
 0x2b4   :  { %v233_v3 = vsub.f32 0.0, %v229_v2 }
 0x2b6   :  { %v326_v4 = vpop.eup %325  ;;  %v236_v5 = vmul.f32 1.442695, %v233_v3 }
 0x2b7   :  { %v238_v6 = vadd.f32 1.0, %v326_v4 }
 0x2b8   :  { %327 = vpow2.f32 %v236_v5 }
 0x2b9   :  { %329 = vrcp.f32 %v238_v6  ;;  %v251_v12 = vand.u32 2147483648, %v238_v6  ;;  %v249_v14 = vand.u32 2147483647, %v238_v6  ;;  %vm245_vm2 = vweird.f32 %v238_v6 }
 0x2bb   :  { %v252_v17 = vor.u32 1.1754944e-38, %v251_v12  ;;  %vm250_vm4 = vcmp.eq.f32.partialorder %v249_v14, 8.507059e+37 }
 0x2be   :  { %v328_v7 = vpop.eup %327 }
 0x2bf   :  { %v330_v8 = vpop.eup %329  ;;  %v239_v9 = vadd.f32 1.0, %v328_v7 }
 0x2c0   :  { %v241_v10 = vmul.f32 %v330_v8, %v238_v6  ;;  %vm246_vm0 = vweird.f32 %v330_v8 }
 0x2c1   :  { %331 = vrcp.f32 %v239_v9  ;;  %vm247_vm3 = vmor %vm245_vm2, %vm246_vm0  ;;  %v266_v22 = vand.u32 2147483648, %v239_v9  ;;  %v264_v24 = vand.u32 2147483647, %v239_v9  ;;  %vm260_vm6 = vweird.f32 %v239_v9 }
 0x2c2   :  { %v242_v11 = vsub.f32 1.0, %v241_v10 }
 0x2c3   :  { %v267_v26 = vor.u32 1.1754944e-38, %v266_v22  ;;  %vm265_vm8 = vcmp.eq.f32.partialorder %v264_v24, 8.507059e+37 }
 0x2c4   :  { %v243_v13 = vmul.f32 %v330_v8, %v242_v11 }
 0x2c6   :  { %v244_v15 = vadd.f32 %v330_v8, %v243_v13 }
 0x2c7   :  { %v332_v16 = vpop.eup %331 }
 0x2c8   :  { %v256_v18 = vmul.f32 %v332_v16, %v239_v9  ;;  %v248_v19 = vsel %vm247_vm3, %v330_v8, %v244_v15  ;;  %vm261_vm5 = vweird.f32 %v332_v16 }
 0x2c9   :  { %v253_v20 = vsel %vm250_vm4, %v252_v17, %v248_v19  ;;  %vm262_vm7 = vmor %vm260_vm6, %vm261_vm5 }
 0x2ca   :  { %v257_v21 = vsub.f32 1.0, %v256_v18  ;;  %270 = vst.msk [vmem:[#allocation2] sm:$0xff] %vm26_vm1, %v253_v20 }
 0x2cc   :  { %v258_v23 = vmul.f32 %v332_v16, %v257_v21 }
 0x2ce   :  { %v259_v25 = vadd.f32 %v332_v16, %v258_v23 }
 0x2d0   :  { %v263_v27 = vsel %vm262_vm7, %v332_v16, %v259_v25 }
 0x2d1   :  { %v268_v28 = vsel %vm265_vm8, %v267_v26, %v263_v27 }
 0x2d2   :  { %271 = vst.msk [vmem:[#allocation2 + $0x8] sm:$0xff] %vm26_vm1, %v268_v28 }
 0x2d3   :  { %284 = dma.vmem_to_hbm [thread:$0]  %s277_s7, 256, %s279_s10, [#allocation3], %s362_s11, %s362_s11, %s363_s12  }
 0x2d4   :  { %357 = dma.done.wait [#allocation3], 256  }
 0x2d5   :  { %358 = vsyncadd [#allocation3], 4294967040 }
 0x2d6   :  { %289 = vsyncpa [#allocation3], 1 }

</bundles_post_ra>
